<compile_context>
chip_gen: v5e
topology: v5e:2x2
jax: 0.10.0
libtpu: 0.0.40
codegen_flags: <defaults>
</compile_context>

<pallas_src>
import jax
import jax.numpy as jnp
from jax.experimental import pallas as pl
from jax.experimental.pallas import tpu as pltpu

LANE = 128


def _round_up(x, m):
    return (x + m - 1) // m * m


def _pad2d(a, rows, cols):
    return jnp.pad(a, ((0, rows - a.shape[0]), (0, cols - a.shape[1])))


# ----------------------------------------------------------------------------
# Pallas kernel: one GraphConv layer, tiled over (row tiles, reduction tiles).
# ----------------------------------------------------------------------------
def _graphconv_kernel(a_ref, x_ref, w_rel_ref, b_rel_ref, w_root_ref,
                      out_ref, acc_ref):
    i = pl.program_id(0)
    k = pl.program_id(1)
    tm = out_ref.shape[0]
    tk = a_ref.shape[1]

    @pl.when(k == 0)
    def _init():
        acc_ref[...] = jnp.zeros_like(acc_ref)

    # agg accumulation: A[i, k] @ X[k]  (bf16 operands, f32 accumulation on the MXU).
    # X is resident in VMEM; slice the (tk, Din) reduction chunk directly (no re-DMA).
    k_off = pl.multiple_of(k * tk, tk)
    xk = x_ref[pl.ds(k_off, tk), :]                      # (tk, Din) bf16
    acc_ref[...] += jnp.dot(a_ref[...], xk, preferred_element_type=jnp.float32)

    @pl.when(k == pl.num_programs(1) - 1)
    def _finalize():
        # Bias + root term added exactly once, after the K reduction.
        i_off = pl.multiple_of(i * tm, tm)
        xi = x_ref[pl.ds(i_off, tm), :].astype(jnp.float32)   # (tm, Din) root-term rows
        agg = acc_ref[...]                                     # (tm, Din) f32
        out = jnp.dot(agg, w_rel_ref[...], preferred_element_type=jnp.float32)
        out = out + b_rel_ref[...]                             # (1, Dout) broadcast
        out = out + jnp.dot(xi, w_root_ref[...], preferred_element_type=jnp.float32)
        out_ref[...] = out.astype(out_ref.dtype)


def graphconv_pallas(x_bf16, adj_bf16, w_rel, b_rel, w_root, *, tm, tk):
    """One GraphConv layer on padded inputs.

    x_bf16:   [Npad_x, Din_pad]        bf16 (resident in VMEM; covers both A axes)
    adj_bf16: [Npad_m, Npad_k]         bf16, adj[dst, src] = edge weight
    w_rel:    [Din_pad, Dout_pad] f32  b_rel: [1, Dout_pad]  w_root: [Din_pad, Dout_pad]
    returns   [Npad_m, Dout_pad] f32
    """
    npad_x, din = x_bf16.shape
    npad_m, npad_k = adj_bf16.shape
    dout = w_rel.shape[1]
    assert x_bf16.dtype == jnp.bfloat16 and adj_bf16.dtype == jnp.bfloat16
    assert npad_m % tm == 0 and npad_k % tk == 0
    assert npad_x >= npad_m and npad_x >= npad_k
    assert tm % 8 == 0 and tk % LANE == 0
    assert din % LANE == 0 and dout % LANE == 0

    grid = (npad_m // tm, npad_k // tk)

    # VMEM budget: A double buffer + resident X + acc + out tiles + weights, 2x margin,
    # capped below v7x's 64 MiB/TC physical VMEM.
    est = (2 * tm * tk * 2            # A (bf16, double-buffered)
           + 2 * npad_x * din * 2     # resident X (bf16, possibly double-buffered)
           + tm * din * 4             # f32 accumulator
           + 2 * tm * dout * 4        # output tiles
           + 2 * din * dout * 4       # W_rel + W_root
           + dout * 4)                # bias
    vmem_limit = int(min(48 * 1024 * 1024, max(32 * 1024 * 1024, 2 * est)))

    return pl.pallas_call(
        _graphconv_kernel,
        out_shape=jax.ShapeDtypeStruct((npad_m, dout), jnp.float32),
        grid_spec=pltpu.PrefetchScalarGridSpec(
            num_scalar_prefetch=0,
            grid=grid,
            in_specs=[
                pl.BlockSpec((tm, tk), lambda i, k: (i, k)),       # A tile (bf16)
                pl.BlockSpec((npad_x, din), lambda i, k: (0, 0)),  # X resident (bf16)
                pl.BlockSpec((din, dout), lambda i, k: (0, 0)),    # W_rel (resident)
                pl.BlockSpec((1, dout), lambda i, k: (0, 0)),      # b_rel
                pl.BlockSpec((din, dout), lambda i, k: (0, 0)),    # W_root
            ],
            out_specs=pl.BlockSpec((tm, dout), lambda i, k: (i, 0)),
            scratch_shapes=[pltpu.VMEM((tm, din), jnp.float32)],
        ),
        compiler_params=pltpu.CompilerParams(
            dimension_semantics=("parallel", "arbitrary"),
            vmem_limit_bytes=vmem_limit,
        ),
    )(adj_bf16, x_bf16, w_rel, b_rel, w_root)


# ----------------------------------------------------------------------------
# Glue: per-layer weighted adjacency, padded independently on each axis.
# Scatter-accumulate in f32 (exact for duplicate edges), single cast to bf16.
# TODO(synk): per-(i,k) tile-nonzero bitmap via scalar prefetch to skip empty A
#             tiles, or a full CSR rewrite, for genuinely sparse graphs.
# ----------------------------------------------------------------------------
def build_adjacency(edge_index, edge_weight, npad_m, npad_k):
    src = edge_index[0]
    dst = edge_index[1]
    adj = jnp.zeros((npad_m, npad_k), jnp.float32)
    adj = adj.at[dst, src].add(edge_weight.astype(jnp.float32))
    return adj.astype(jnp.bfloat16)


# ----------------------------------------------------------------------------
# Model
# ----------------------------------------------------------------------------
class GCNPallas:
    """Mirror of the PyTorch GCN module (two GraphConv layers)."""

    def __init__(self, g_dim, h1_dim, h2_dim, key):
        k1, k2, k3, k4, k5, k6 = jax.random.split(key, 6)
        s1 = 1.0 / jnp.sqrt(jnp.float32(g_dim))
        s2 = 1.0 / jnp.sqrt(jnp.float32(h1_dim))
        self.g_dim, self.h1_dim, self.h2_dim = g_dim, h1_dim, h2_dim

        # conv1 parameters (stored already transposed: [Din, Dout])
        self.w_rel1 = jax.random.uniform(k1, (g_dim, h1_dim), jnp.float32, -s1, s1)
        self.b_rel1 = jax.random.uniform(k5, (1, h1_dim), jnp.float32, -s1, s1)
        self.w_root1 = jax.random.uniform(k2, (g_dim, h1_dim), jnp.float32, -s1, s1)
        # conv2 parameters
        self.w_rel2 = jax.random.uniform(k3, (h1_dim, h2_dim), jnp.float32, -s2, s2)
        self.b_rel2 = jax.random.uniform(k6, (1, h2_dim), jnp.float32, -s2, s2)
        self.w_root2 = jax.random.uniform(k4, (h1_dim, h2_dim), jnp.float32, -s2, s2)

        # Lane-dense, zero-padded copies (feature dims -> multiples of 128).
        gp, h1p, h2p = (_round_up(d, LANE) for d in (g_dim, h1_dim, h2_dim))
        self.g_pad, self.h1_pad, self.h2_pad = gp, h1p, h2p
        self.w_rel1_p = _pad2d(self.w_rel1, gp, h1p)
        self.b_rel1_p = _pad2d(self.b_rel1, 1, h1p)
        self.w_root1_p = _pad2d(self.w_root1, gp, h1p)
        self.w_rel2_p = _pad2d(self.w_rel2, h1p, h2p)
        self.b_rel2_p = _pad2d(self.b_rel2, 1, h2p)
        self.w_root2_p = _pad2d(self.w_root2, h1p, h2p)

    def __call__(self, node_features, edge_index, edge_type, *,
                 tm=512, tk=1024, return_hidden=False):
        n = node_features.shape[0]
        n128 = _round_up(n, LANE)

        # Clamp tiles to the (128-padded) graph size; keep them multiples of 128.
        tm = min(_round_up(tm, LANE), n128)
        tk = min(_round_up(tk, LANE), n128)
        # v7x has 2 TensorCores: prefer >=2 row tiles so the 'parallel' axis shards.
        if _round_up(n, tm) // tm < 2 and n128 >= 2 * LANE:
            tm = max(LANE, (n128 // 2 // LANE) * LANE)

        # Independent padding: A rows (dst) -> tm, A cols / reduction (src) -> tk.
        npad_m = _round_up(n, tm)
        npad_k = _round_up(n, tk)
        npad_x = max(npad_m, npad_k)   # X must cover both the row and reduction views

        # conv1 adjacency weighted by edge_type (as in the original forward);
        # conv2 adjacency unweighted (all ones).
        ew1 = edge_type.astype(jnp.float32)
        ew2 = jnp.ones((edge_index.shape[1],), jnp.float32)
        adj1 = build_adjacency(edge_index, ew1, npad_m, npad_k)
        adj2 = build_adjacency(edge_index, ew2, npad_m, npad_k)

        # Pre-cast X to bf16 once in the wrapper (kernel streams it at 2 B/elem).
        x0 = _pad2d(node_features.astype(jnp.float32), npad_x, self.g_pad)
        x0 = x0.astype(jnp.bfloat16)
        x1 = graphconv_pallas(x0, adj1, self.w_rel1_p, self.b_rel1_p,
                              self.w_root1_p, tm=tm, tk=tk)        # (npad_m, h1_pad) f32
        # TODO(synk): fuse conv1+conv2 into one pallas_call so the [N, h1]
        #             intermediate stays in VMEM instead of round-tripping HBM.
        x1b = _pad2d(x1, npad_x, self.h1_pad).astype(jnp.bfloat16)
        x2 = graphconv_pallas(x1b, adj2, self.w_rel2_p, self.b_rel2_p,
                              self.w_root2_p, tm=tm, tk=tk)        # (npad_m, h2_pad) f32
        out = x2[:n, :self.h2_dim]
        if return_hidden:
            return out, x1[:n, :self.h1_dim]
        return out


# ----------------------------------------------------------------------------
# References (for sanity checks)
# ----------------------------------------------------------------------------
def _conv_ref_f32(x, adj, w_rel, b_rel, w_root):
    return adj @ x @ w_rel + b_rel + x @ w_root


def _conv_ref_kernel_math(x, adj, w_rel, b_rel, w_root):
    # Mirrors the kernel numerics: A and X are rounded to bf16 (products exact in
    # f32, accumulation in f32); weights / bias / epilogue matmuls stay f32.
    a = adj.astype(jnp.bfloat16).astype(jnp.float32)
    xb = x.astype(jnp.bfloat16).astype(jnp.float32)
    return (a @ xb) @ w_rel + b_rel + xb @ w_root


if __name__ == "__main__":
    key = jax.random.PRNGKey(0)
    k_feat, k_edge, k_type, k_param = jax.random.split(key, 4)

    # Small but multi-tile: N nodes, g_dim -> h1_dim -> h2_dim
    N, E = 300, 900
    g_dim, h1_dim, h2_dim = 16, 32, 16

    node_features = jax.random.normal(k_feat, (N, g_dim), dtype=jnp.float32)
    edge_index = jax.random.randint(k_edge, (2, E), 0, N, dtype=jnp.int32)
    # edge_type (relation ids) — used by conv1 as edge_weight, matching the forward
    edge_type = jax.random.randint(k_type, (E,), 0, 4, dtype=jnp.int32).astype(jnp.float32)

    model = GCNPallas(g_dim, h1_dim, h2_dim, k_param)

    # Small tiles -> (3, 3) grid, exercises the accumulator pipeline.
    out, hid = model(node_features, edge_index, edge_type,
                     tm=128, tk=128, return_hidden=True)
    out = jax.block_until_ready(out)
    assert out.shape == (N, h2_dim)
    assert hid.shape == (N, h1_dim)

    # Default (large, clamped) tiles must agree with the multi-tile run.
    out_big = jax.block_until_ready(model(node_features, edge_index, edge_type))
    assert jnp.allclose(out, out_big, atol=2e-3, rtol=2e-3)

    # Dense f32 adjacencies for the references.
    src, dst = edge_index[0], edge_index[1]
    adj1 = jnp.zeros((N, N), jnp.float32).at[dst, src].add(edge_type)
    adj2 = jnp.zeros((N, N), jnp.float32).at[dst, src].add(1.0)

    # Tight per-layer checks against a reference mirroring the kernel's bf16 math.
    hid_ref = _conv_ref_kernel_math(node_features, adj1,
                                    model.w_rel1, model.b_rel1, model.w_root1)
    assert jnp.allclose(hid, hid_ref, atol=2e-3, rtol=2e-3)
    out_ref2 = _conv_ref_kernel_math(hid, adj2,
                                     model.w_rel2, model.b_rel2, model.w_root2)
    assert jnp.allclose(out, out_ref2, atol=2e-3, rtol=2e-3)

    # Loose end-to-end check against the pure-f32 semantics of the PyTorch module
    # (difference comes only from bf16 rounding of A and X in the aggregation/root paths).
    x1_f32 = _conv_ref_f32(node_features, adj1, model.w_rel1, model.b_rel1, model.w_root1)
    out_f32 = _conv_ref_f32(x1_f32, adj2, model.w_rel2, model.b_rel2, model.w_root2)
    rel_err = jnp.linalg.norm(out - out_f32) / jnp.linalg.norm(out_f32)
    assert rel_err < 3e-2, rel_err

    print("KERNEL_OK")
</pallas_src>

<mosaic_0001>
module attributes {stable_mosaic.version = 11 : i64} {
  func.func @_graphconv_kernel(%arg0: i32, %arg1: i32, %arg2: memref<128x128xbf16, #tpu.memory_space<vmem>>, %arg3: memref<384x128xbf16, #tpu.memory_space<vmem>>, %arg4: memref<128x128xf32, #tpu.memory_space<vmem>>, %arg5: memref<1x128xf32, #tpu.memory_space<vmem>>, %arg6: memref<128x128xf32, #tpu.memory_space<vmem>>, %arg7: memref<128x128xf32, #tpu.memory_space<vmem>>, %arg8: memref<128x128xf32, #tpu.memory_space<vmem>>) attributes {dimension_semantics = [#tpu.dimension_semantics<parallel>, #tpu.dimension_semantics<arbitrary>], iteration_bounds = array<i64: 3, 3>, scalar_prefetch = 0 : i64, scratch_operands = 1 : i64, tpu.core_type = #tpu.core_type<tc>, window_params = [{transform_indices = @transform_0, window_bounds = array<i64: 128, 128>}, {pipeline_mode = #tpu.pipeline_mode<synchronous>, transform_indices = @transform_1, window_bounds = array<i64: 384, 128>}, {pipeline_mode = #tpu.pipeline_mode<synchronous>, transform_indices = @transform_2, window_bounds = array<i64: 128, 128>}, {pipeline_mode = #tpu.pipeline_mode<synchronous>, transform_indices = @transform_3, window_bounds = array<i64: 1, 128>}, {pipeline_mode = #tpu.pipeline_mode<synchronous>, transform_indices = @transform_4, window_bounds = array<i64: 128, 128>}, {transform_indices = @transform_5, window_bounds = array<i64: 128, 128>}]} {
    %c0_i32 = arith.constant 0 : i32
    %0 = arith.cmpi eq, %arg1, %c0_i32 : i32
    %1 = arith.extui %0 : i1 to i32
    %c0_i32_0 = arith.constant 0 : i32
    %2 = arith.cmpi ne, %1, %c0_i32_0 : i32
    scf.if %2 {
      %cst_8 = arith.constant 0.000000e+00 : f32
      %15 = vector.broadcast %cst_8 : f32 to vector<128x128xf32>
      %c0_9 = arith.constant 0 : index
      %c0_10 = arith.constant 0 : index
      %16 = vector.load %arg8[%c0_9, %c0_10] : memref<128x128xf32, #tpu.memory_space<vmem>>, vector<128x128xf32>
      tpu.vector_store %arg8[%c0_9, %c0_10], %15 {strides = array<i32>} : memref<128x128xf32, #tpu.memory_space<vmem>>, vector<128x128xf32>,
    } else {
    }
    %c128_i32 = arith.constant 128 : i32
    %3 = arith.muli %arg1, %c128_i32 : i32
    %4 = tpu.assume_multiple %3, 128 : i32
    %5 = arith.index_cast %4 : i32 to index
    %c0 = arith.constant 0 : index
    %6 = vector.load %arg3[%5, %c0] : memref<384x128xbf16, #tpu.memory_space<vmem>>, vector<128x128xbf16>
    %c0_1 = arith.constant 0 : index
    %c0_2 = arith.constant 0 : index
    %7 = vector.load %arg8[%c0_1, %c0_2] : memref<128x128xf32, #tpu.memory_space<vmem>>, vector<128x128xf32>
    %c0_3 = arith.constant 0 : index
    %c0_4 = arith.constant 0 : index
    %8 = vector.load %arg2[%c0_3, %c0_4] : memref<128x128xbf16, #tpu.memory_space<vmem>>, vector<128x128xbf16>
    %cst = arith.constant dense<0.000000e+00> : vector<128x128xf32>
    %9 = tpu.matmul %8, %6, %cst {dimension_numbers = #tpu.dot_dimension_numbers<[1], [0], [0], [1], [0, 0, 1, 1], [], []>} : vector<128x128xbf16>, vector<128x128xbf16>, vector<128x128xf32> -> vector<128x128xf32>
    %10 = arith.addf %7, %9 : vector<128x128xf32>
    %c0_5 = arith.constant 0 : index
    %c0_6 = arith.constant 0 : index
    %11 = vector.load %arg8[%c0_5, %c0_6] : memref<128x128xf32, #tpu.memory_space<vmem>>, vector<128x128xf32>
    tpu.vector_store %arg8[%c0_5, %c0_6], %10 {strides = array<i32>} : memref<128x128xf32, #tpu.memory_space<vmem>>, vector<128x128xf32>,
    %c2_i32 = arith.constant 2 : i32
    %12 = arith.cmpi eq, %arg1, %c2_i32 : i32
    %13 = arith.extui %12 : i1 to i32
    %c0_i32_7 = arith.constant 0 : i32
    %14 = arith.cmpi ne, %13, %c0_i32_7 : i32
    scf.if %14 {
      %c128_i32_8 = arith.constant 128 : i32
      %15 = arith.muli %arg0, %c128_i32_8 : i32
      %16 = tpu.assume_multiple %15, 128 : i32
      %17 = arith.index_cast %16 : i32 to index
      %c0_9 = arith.constant 0 : index
      %18 = vector.load %arg3[%17, %c0_9] : memref<384x128xbf16, #tpu.memory_space<vmem>>, vector<128x128xbf16>
      %19 = arith.extf %18 : vector<128x128xbf16> to vector<128x128xf32>
      %c0_10 = arith.constant 0 : index
      %c0_11 = arith.constant 0 : index
      %20 = vector.load %arg8[%c0_10, %c0_11] : memref<128x128xf32, #tpu.memory_space<vmem>>, vector<128x128xf32>
      %c0_12 = arith.constant 0 : index
      %c0_13 = arith.constant 0 : index
      %21 = vector.load %arg4[%c0_12, %c0_13] : memref<128x128xf32, #tpu.memory_space<vmem>>, vector<128x128xf32>
      %cst_14 = arith.constant dense<0.000000e+00> : vector<128x128xf32>
      %22 = tpu.matmul %20, %21, %cst_14 {dimension_numbers = #tpu.dot_dimension_numbers<[1], [0], [0], [1], [0, 0, 1, 1], [], []>} : vector<128x128xf32>, vector<128x128xf32>, vector<128x128xf32> -> vector<128x128xf32>
      %c0_15 = arith.constant 0 : index
      %c0_16 = arith.constant 0 : index
      %23 = vector.load %arg5[%c0_15, %c0_16] : memref<1x128xf32, #tpu.memory_space<vmem>>, vector<1x128xf32>
      %24 = vector.broadcast %23 : vector<1x128xf32> to vector<128x128xf32>
      %25 = arith.addf %22, %24 : vector<128x128xf32>
      %c0_17 = arith.constant 0 : index
      %c0_18 = arith.constant 0 : index
      %26 = vector.load %arg6[%c0_17, %c0_18] : memref<128x128xf32, #tpu.memory_space<vmem>>, vector<128x128xf32>
      %cst_19 = arith.constant dense<0.000000e+00> : vector<128x128xf32>
      %27 = tpu.matmul %19, %26, %cst_19 {dimension_numbers = #tpu.dot_dimension_numbers<[1], [0], [0], [1], [0, 0, 1, 1], [], []>} : vector<128x128xf32>, vector<128x128xf32>, vector<128x128xf32> -> vector<128x128xf32>
      %28 = arith.addf %25, %27 : vector<128x128xf32>
      %c0_20 = arith.constant 0 : index
      %c0_21 = arith.constant 0 : index
      %29 = vector.load %arg7[%c0_20, %c0_21] : memref<128x128xf32, #tpu.memory_space<vmem>>, vector<128x128xf32>
      tpu.vector_store %arg7[%c0_20, %c0_21], %28 {strides = array<i32>} : memref<128x128xf32, #tpu.memory_space<vmem>>, vector<128x128xf32>,
    } else {
    }
    return
  }
  func.func @transform_0(%arg0: i32, %arg1: i32) -> (i32, i32) {
    %c0_i32 = arith.constant 0 : i32
    return %arg0, %arg1 : i32, i32
  }
  func.func @transform_1(%arg0: i32, %arg1: i32) -> (i32, i32) {
    %c0_i32 = arith.constant 0 : i32
    %c0_i32_0 = arith.constant 0 : i32
    %c0_i32_1 = arith.constant 0 : i32
    return %c0_i32, %c0_i32_0 : i32, i32
  }
  func.func @transform_2(%arg0: i32, %arg1: i32) -> (i32, i32) {
    %c0_i32 = arith.constant 0 : i32
    %c0_i32_0 = arith.constant 0 : i32
    %c0_i32_1 = arith.constant 0 : i32
    return %c0_i32, %c0_i32_0 : i32, i32
  }
  func.func @transform_3(%arg0: i32, %arg1: i32) -> (i32, i32) {
    %c0_i32 = arith.constant 0 : i32
    %c0_i32_0 = arith.constant 0 : i32
    %c0_i32_1 = arith.constant 0 : i32
    return %c0_i32, %c0_i32_0 : i32, i32
  }
  func.func @transform_4(%arg0: i32, %arg1: i32) -> (i32, i32) {
    %c0_i32 = arith.constant 0 : i32
    %c0_i32_0 = arith.constant 0 : i32
    %c0_i32_1 = arith.constant 0 : i32
    return %c0_i32, %c0_i32_0 : i32, i32
  }
  func.func @transform_5(%arg0: i32, %arg1: i32) -> (i32, i32) {
    %c0_i32 = arith.constant 0 : i32
    %c0_i32_0 = arith.constant 0 : i32
    return %arg0, %c0_i32 : i32, i32
  }
}

</mosaic_0001>

<bundles_post_ra>
// kernel: tpu_custom_call.1
= control target key start
LH: loop header
LB: loop body
LE: loop exit
PB: predicated region body
PF: predicated region fallthrough
CT: control target
= control target key end

     0   :  { %s1887_s0 = inlined_call_operand.hbm [shape: bf16[384,384], index: 0, kind: input, shape index: {}]   ;;  %s1888_s1 = inlined_call_operand.hbm [shape: bf16[384,128], index: 1, kind: input, shape index: {}]   ;;  %s1889_s2 = inlined_call_operand.hbm [shape: f32[128,128], index: 2, kind: input, shape index: {}]   ;;  %s1890_s3 = inlined_call_operand.vmem [shape: f32[1,128], index: 3, kind: input, shape index: {}]   ;;  %s1891_s4 = inlined_call_operand.hbm [shape: f32[128,128], index: 4, kind: input, shape index: {}]   ;;  %s1892_s5 = inlined_call_operand.hbm [shape: f32[384,128], index: 5, kind: output, shape index: {}]  }
   0x1   :  { %1902 = sst [smem:[#allocation22_spill]] %s1888_s1 }
   0x2   :  { %1903 = sst [smem:[#allocation23_spill]] %s1889_s2 }
   0x3   :  { %1904 = sst [smem:[#allocation24_spill]] %s1890_s3 }
   0x4   :  { %1905 = sst [smem:[#allocation25_spill]] %s1891_s4 }
   0x5   :  { %1906 = sst [smem:[#allocation26_spill]] %s1892_s5 }
   0x6   :  { %10 = vsyncpa [#allocation4], 0 }
   0x7   :  { %12 = vsyncpa [#allocation4 + $0x1], 0 }
   0x8   :  { %13 = vsyncpa [#allocation7], 0 }
   0x9   :  { %14 = vsyncpa [#allocation10], 0 }
   0xa   :  { %15 = vsyncpa [#allocation5], 0 }
   0xb   :  { %17 = vsyncpa [#allocation5 + $0x1], 0  ;;  %s1593_s18 = smov 0   ;;  %s1595_s19 = smov 0  }
   0xc   :  { %s1597_s20 = smov 0   ;;  %s1599_s21 = smov 0  }
   0xd   :  { %s1601_s22 = smov 0   ;;  %s1603_s23 = smov 0  }
   0xe   :  { %s1605_s24 = smov 0   ;;  %s1607_s25 = smov 0  }
   0xf   :  { %s1609_s26 = smov 0   ;;  %s1611_s27 = smov 0  }
  0x10   :  { %s1613_s28 = smov 0  }
  0x11 LB: > { %1907 = sst [smem:[#allocation16_spill]] %s1510_s18  ;;  %s953_s29 = sadd.s32 4294967295, %s1550_s28   ;;  %s1550_s28 = sphi %s1613_s28, %s23_s28   ;;  %s1546_s27 = sphi %s1611_s27, %s1943_s27   ;;  %s1542_s26 = sphi %s1609_s26, %s1942_s26   ;;  %s1538_s25 = sphi %s1607_s25, %s1941_s25   ;;  %s1534_s24 = sphi %s1605_s24, %s1940_s24   ;;  %s1530_s23 = sphi %s1603_s23, %s1939_s23   ;;  %s1526_s22 = sphi %s1601_s22, %s1938_s22   ;;  %s1522_s21 = sphi %s1599_s21, %s1937_s21   ;;  %s1518_s20 = sphi %s1597_s20, %s1936_s20   ;;  %s1514_s19 = sphi %s1595_s19, %s1935_s19   ;;  %s1510_s18 = sphi %s1593_s18, %s1934_s18  }
  0x12   : > { %1908 = sst [smem:[#allocation17_spill]] %s1538_s25  ;;  %s954_s30 = sadd.s32 4294967294, %s1550_s28  }
  0x13   : > { %p57_p0 = scmp.ne.s32.totalorder %s1526_s22, %s1522_s21  ;;  %p1649_p1 = scmp.eq.s32.totalorder %s953_s29, 0 }
  0x14   : > { %p164_p2 = scmp.ne.s32.totalorder %s1518_s20, %s1514_s19  ;;  %p165_p3 = scmp.eq.s32.totalorder %s953_s29, 8 }
  0x15   : > { %p1657_p4 = por %p1649_p1, %p57_p0  ;;  %p170_p5 = scmp.ne.s32.totalorder %s1514_s19, %s1510_s18 }
  0x16   : > { %p1663_p6 = por %p165_p3, %p164_p2  ;;  %p171_p7 = scmp.eq.s32.totalorder %s954_s30, 8 }
  0x17   : > { %p955_p8 = scmp.ge.s32.totalorder %s1550_s28, 1  ;;  %p178_p9 = scmp.lt.s32.totalorder %s1550_s28, 10 }
  0x18   : > { %s1911_s8 = scalar_select %p1663_p6, 1, 0 }
  0x19   : > { %p1669_p10 = por %p171_p7, %p170_p5  ;;  %p1673_p11 = pnand %p955_p8, %p178_p9 }
  0x1a   : > { %1912 = sst [smem:[#allocation18_spill]] %s1911_s8  ;;  %s1552_s14 = smov [#allocation6]  }
  0x1b   : > { %s1913_s9 = scalar_select %p1669_p10, 1, 0 }
  0x1c   : > { %s1916_s1 = sld [smem:[#allocation22_spill]]  ;;  %p1174_p12 = pneg %p1673_p11 }
  0x1d   : > { %1914 = sst [smem:[#allocation19_spill]] %s1913_s9  ;;  %s191_s15 = sshll.u32 %s1552_s14, 4  ;;  %s192_s15 = int_to_ptr.vmem [resolvable:$true] %s191_s15 }
  0x1e   : > { %p1684_p13 = pnand %p1174_p12, %p1649_p1  ;;  %s1918_s2 = sld [smem:[#allocation23_spill]] }
  0x1f   : > { %s1894_s30 = smov 64   ;;  %s1895_s11 = smov 4  }
  0x20   : > { %s1555_s12 = smov [#allocation8]   ;;  %s1919_s4 = sld [smem:[#allocation25_spill]] }
  0x21   : > { %s205_s14 = sshll.u32 %s1555_s12, 4  ;;  %s1557_s9 = smov 8   ;;  %s206_s14 = int_to_ptr.vmem [resolvable:$true] %s205_s14 }
  0x22   : > { %s189_s13 = sshll.u32 %s1916_s1, 4  ;;  %s32_s12 = sadd.s32 1, %s1542_s26  ;;  %s190_s13 = int_to_ptr.hbm [resolvable:$true] %s189_s13 }
  0x23   : > { %1177 = dma.hbm_to_vmem [thread:$0]  (!%p1684_p13), %s190_s13, 3072, %s192_s15, [#allocation7], %s1894_s30, %s1894_s30, %s1895_s11  }
  0x24   : > { %s203_s29 = sshll.u32 %s1918_s2, 4  ;;  %s1556_s2 = smov 128   ;;  %s204_s29 = int_to_ptr.hbm [resolvable:$true] %s203_s29 }
  0x25   : > { %1180 = dma.hbm_to_vmem [thread:$0]  (!%p1684_p13), %s204_s29, 2048, %s206_s14, [#allocation7], %s1556_s2, %s1556_s2, %s1557_s9  }
  0x26   : > { %s220_s1 = sshll.u32 %s1919_s4, 4  ;;  %s1558_s13 = smov [#allocation9]   ;;  %s221_s1 = int_to_ptr.hbm [resolvable:$true] %s220_s1 }
  0x27   : > { %s222_s15 = sshll.u32 %s1558_s13, 4  ;;  %s35_s30 = sadd.s32 1, %s1546_s27  ;;  %s223_s15 = int_to_ptr.vmem [resolvable:$true] %s222_s15 }
  0x28   : > { %1183 = dma.hbm_to_vmem [thread:$0]  (!%p1684_p13), %s221_s1, 2048, %s223_s15, [#allocation10], %s1556_s2, %s1556_s2, %s1557_s9  }
  0x29   : > { %p33_p0 = scmp.ge.s32.totalorder %s32_s12, 3  ;;  %s44_s17 = sadd.s32 1, %s1530_s23 }
  0x2a   : > { %p51_p2 = scmp.ne.s32.totalorder %s1530_s23, %s1526_s22  ;;  %p52_p3 = scmp.eq.s32.totalorder %s1550_s28, 0 }
  0x2b   : > { %s1945_s12 = smov (%p33_p0, %s32_s12), 0  ;;  %s1947_s30 = smov (!%p33_p0, %s35_s30), %s1546_s27 }
  0x2c   : > { %1920 = sst [smem:[#allocation20_spill]] %s1945_s12  ;;  %s40_s29 = ssub.s32 %s1542_s26, %s1945_s12 }
  0x2d   : > { %p1714_p5 = por %p52_p3, %p51_p2  ;;  %p37_p7 = scmp.ge.s32.totalorder %s1947_s30, 3 }
  0x2e   : > { %s154_s1 = sadd.s32 1, %s1518_s20  ;;  %p1195_p8 = scmp.lt.s32.totalorder %s1550_s28, 9 }
  0x2f   : > { %s236_s2 = sand.u32 1, %s1530_s23   ;;  %s1949_s30 = smov (%p37_p7, %s1947_s30), 0 }
  0x30   : > { %1922 = sst [smem:[#allocation21_spill]] %s1949_s30  ;;  %s960_s9 = sshll.u32 %s236_s2, 6 }
  0x31   : > { %s39_s16 = ssub.s32 %s1546_s27, %s1949_s30  ;;  %s1157_s13 = smul.u32 48, %s1546_s27 }
  0x32   : > { %s41_s21 = sor.u32 %s40_s29, %s39_s16  ;;  %p152_p9 = scmp.eq.s32.totalorder %s39_s16, 0 }
  0x33   : > { %p42_p12 = scmp.eq.s32.totalorder %s41_s21, 0  ;;  %s245_s4 = sadd.s32 %s1542_s26, %s1157_s13 }
  0x34   : > { %s1727_s15 = scalar_select %p152_p9, %s1518_s20, %s154_s1  }
  0x35   : > { %s1730_s11 = scalar_select %p42_p12, %s1530_s23, %s44_s17  }
  0x36   : > { %s240_s12 = scalar_lea.vmem [#allocation3], %s960_s9  ;;  %s963_s5 = sshll.u32 %s245_s4, 2 }
  0x37   : > { %s250_s18 = sshll.u32 %s240_s12, 4  ;;  %s247_s25 = scalar_lea.hbm %s1887_s0, %s963_s5  ;;  %s251_s18 = int_to_ptr.vmem [resolvable:$true] %s250_s18 }
  0x38   : > { %p1185_p13 = pnand %p1195_p8, %p1714_p5  ;;  %s248_s29 = sshll.u32 %s247_s25, 4  ;;  %s249_s29 = int_to_ptr.hbm [resolvable:$true] %s248_s29 }
  0x39   : > { %s237_s16 = scalar_lea.sflag [#allocation4], %s236_s2  ;;  %s1559_s21 = smov 192  }
  0x3a   : > { %s1923_s1 = smov 4   ;;  %s1924_s30 = smov 64  }
  0x3b   : > { %1187 = dma.hbm_to_vmem [thread:$0]  (!%p1185_p13), %s249_s29, 1024, %s251_s18, %s237_s16, %s1559_s21, %s1924_s30, %s1923_s1  }
  0x3c   : > { %262 = sbr.rel (%p1673_p11) target bundleno = 538 (0x21a), region = 40  ;;  %s264_s4 = sand.u32 (!%p1673_p11), 1, %s1526_s22  }
  0x3d   : > { %s965_s12 = sshll.u32 (!%p1673_p11), %s264_s4, 6  ;;  %s265_s17 = scalar_lea.sflag (!%p1673_p11), [#allocation4], %s264_s4 }
  0x3e   : > { %s1745_s3 = scalar_lea.vmem (!%p1673_p11), [#allocation3], %s965_s12 }
  0x41   : > { %1493 = dma.done.wait (%p1657_p4), %s265_s17, 1024  }
  0x42   : > { %1495 = vsyncadd (%p1657_p4), %s265_s17, 4294966272 }
  0x43   : > { %1497 = dma.done.wait (%p1649_p1), [#allocation7], 5120  }
  0x44   : > { %1499 = vsyncadd (%p1649_p1), [#allocation7], 4294962176 }
  0x45   : > { %1501 = dma.done.wait (%p1649_p1), [#allocation10], 2048  }
  0x46   : > { %1503 = vsyncadd (%p1649_p1), [#allocation10], 4294965248  ;;  %s308_s5 = sand.u32 1, %s1514_s19   ;;  %p970_p4 = scmp.ne.s32.totalorder %s1534_s24, 0 }
  0x47   : > { %s969_s18 = sshll.u32 %s308_s5, 7 }
  0x48   : > { %s1762_s25 = scalar_lea.vmem [#allocation11], %s969_s18  ;;  %316 = sbr.rel (%p970_p4) target bundleno = 94 (0x5e), region = 60 }
  0x4d   : > { %v1560_v0 = vmov 0.0  }
  0x4e   : > { %317 = vst [vmem:[#allocation2 + $0x30] sm:$0xff] %v1560_v0 }
  0x4f   : > { %318 = vst [vmem:[#allocation2] sm:$0xff] %v1560_v0 }
  0x50   : > { %319 = vst [vmem:[#allocation2 + $0x58] sm:$0xff] %v1560_v0 }
  0x51   : > { %320 = vst [vmem:[#allocation2 + $0x18] sm:$0xff] %v1560_v0 }
  0x52   : > { %321 = vst [vmem:[#allocation2 + $0x50] sm:$0xff] %v1560_v0 }
  0x53   : > { %322 = vst [vmem:[#allocation2 + $0x68] sm:$0xff] %v1560_v0 }
  0x54   : > { %323 = vst [vmem:[#allocation2 + $0x8] sm:$0xff] %v1560_v0 }
  0x55   : > { %324 = vst [vmem:[#allocation2 + $0x48] sm:$0xff] %v1560_v0 }
  0x56   : > { %325 = vst [vmem:[#allocation2 + $0x40] sm:$0xff] %v1560_v0 }
  0x57   : > { %326 = vst [vmem:[#allocation2 + $0x20] sm:$0xff] %v1560_v0 }
  0x58   : > { %327 = vst [vmem:[#allocation2 + $0x10] sm:$0xff] %v1560_v0 }
  0x59   : > { %328 = vst [vmem:[#allocation2 + $0x38] sm:$0xff] %v1560_v0 }
  0x5a   : > { %329 = vst [vmem:[#allocation2 + $0x60] sm:$0xff] %v1560_v0 }
  0x5b   : > { %330 = vst [vmem:[#allocation2 + $0x70] sm:$0xff] %v1560_v0 }
  0x5c   : > { %331 = vst [vmem:[#allocation2 + $0x78] sm:$0xff] %v1560_v0 }
  0x5d   : > { %332 = vst [vmem:[#allocation2 + $0x28] sm:$0xff] %v1560_v0 }
  0x5e PF: > { %s971_s6 = sshll.u32 %s1534_s24, 7  ;;  %v1053_v9 = vld [vmem:[%s1745_s3] sm:$0xff]  ;;  %v1055_v10 = vld [vmem:[%s1745_s3 + $0x10] sm:$0xff]  ;;  %v1054_v13 = vld [vmem:[%s1745_s3 + $0x8] sm:$0xff]  ;;  %p1037_p1 = scmp.ne.s32.totalorder %s1534_s24, 2 }
  0x5f   : > { %s334_s7 = sshra.s32 %s971_s6, 3  ;;  %v1057_v11 = vld [vmem:[%s1745_s3 + $0x20] sm:$0xff]  ;;  %v1059_v12 = vld [vmem:[%s1745_s3 + $0x30] sm:$0xff]  ;;  %v1056_v14 = vld [vmem:[%s1745_s3 + $0x18] sm:$0xff]  ;;  %s1925_s24 = sld [smem:[#allocation17_spill]] (!%p1037_p1) }
  0x60   : > { %s972_s8 = sshll.u32 %s334_s7, 2  ;;  %v1058_v15 = vld [vmem:[%s1745_s3 + $0x28] sm:$0xff]  ;;  %v1060_v16 = vld [vmem:[%s1745_s3 + $0x38] sm:$0xff]  ;;  %v354_v17 = vld [vmem:[#allocation2 + $0x30] sm:$0xff]  ;;  %s1926_s16 = sld [smem:[#allocation24_spill]] (!%p1037_p1) }
  0x61   : > { %s1766_s10 = scalar_lea.vmem [#allocation6], %s972_s8  ;;  %v358_v18 = vld [vmem:[#allocation2 + $0x50] sm:$0xff]  ;;  %v362_v23 = vld [vmem:[#allocation2 + $0x40] sm:$0xff]  ;;  %v359_v26 = vld [vmem:[#allocation2 + $0x68] sm:$0xff] }
  0x62   : > { %v1052_v1 = vld [vmem:[%s1766_s10 + $0x38] sm:$0xff]  ;;  %v1051_v2 = vld [vmem:[%s1766_s10 + $0x30] sm:$0xff]  ;;  %v1050_v3 = vld [vmem:[%s1766_s10 + $0x28] sm:$0xff] }
  0x63   : > { %482 = vmatpush.bf16.msra.mxu0 %v1052_v1  ;;  %1101 = vmatpush.bf16.msra.mxu1 %v1052_v1  ;;  %v1049_v4 = vld [vmem:[%s1766_s10 + $0x20] sm:$0xff]  ;;  %v1048_v5 = vld [vmem:[%s1766_s10 + $0x18] sm:$0xff]  ;;  %v1047_v6 = vld [vmem:[%s1766_s10 + $0x10] sm:$0xff] }
  0x64   : > { %1102 = vmatpush.bf16.msra.mxu2 %v1052_v1  ;;  %1103 = vmatpush.bf16.msra.mxu3 %v1052_v1  ;;  %v1046_v7 = vld [vmem:[%s1766_s10 + $0x8] sm:$0xff]  ;;  %v1045_v8 = vld [vmem:[%s1766_s10] sm:$0xff]  ;;  %v367_v36 = vld [vmem:[#allocation2 + $0x70] sm:$0xff] }
  0x65   : > { %v366_v24 = vld [vmem:[#allocation2 + $0x60] sm:$0xff]  ;;  %v356_v37 = vld [vmem:[#allocation2 + $0x58] sm:$0xff]  ;;  %v360_v38 = vld [vmem:[#allocation2 + $0x8] sm:$0xff]  ;;  %s1038_s30 = sshll.u32 (!%p1037_p1), %s1925_s24, 7 }
  0x66   : > { %v355_v25 = vld [vmem:[#allocation2] sm:$0xff]  ;;  %v364_v47 = vld [vmem:[#allocation2 + $0x10] sm:$0xff]  ;;  %v368_v48 = vld [vmem:[#allocation2 + $0x78] sm:$0xff]  ;;  %s568_s14 = sshra.s32 (!%p1037_p1), %s1038_s30, 3 }
  0x67   : > { %483 = vmatpush.bf16.msra.mxu0 %v1051_v2  ;;  %1104 = vmatpush.bf16.msra.mxu1 %v1051_v2  ;;  %v363_v35 = vld [vmem:[#allocation2 + $0x20] sm:$0xff]  ;;  %v357_v49 = vld [vmem:[#allocation2 + $0x18] sm:$0xff]  ;;  %v361_v50 = vld [vmem:[#allocation2 + $0x48] sm:$0xff]  ;;  %s1039_s2 = sshll.u32 (!%p1037_p1), %s568_s14, 2 }
  0x68   : > { %1105 = vmatpush.bf16.msra.mxu2 %v1051_v2  ;;  %1106 = vmatpush.bf16.msra.mxu3 %v1051_v2  ;;  %v365_v59 = vld [vmem:[#allocation2 + $0x38] sm:$0xff]  ;;  %v369_v60 = vld [vmem:[#allocation2 + $0x28] sm:$0xff]  ;;  %s1786_s9 = scalar_lea.vmem (!%p1037_p1), [#allocation6], %s1039_s2 }
  0x6b   : > { %484 = vmatpush.bf16.msra.mxu0 %v1050_v3  ;;  %1107 = vmatpush.bf16.msra.mxu1 %v1050_v3 }
  0x6c   : > { %1108 = vmatpush.bf16.msra.mxu2 %v1050_v3  ;;  %1109 = vmatpush.bf16.msra.mxu3 %v1050_v3 }
  0x6f   : > { %485 = vmatpush.bf16.msra.mxu0 %v1049_v4  ;;  %1110 = vmatpush.bf16.msra.mxu1 %v1049_v4 }
  0x70   : > { %1111 = vmatpush.bf16.msra.mxu2 %v1049_v4  ;;  %1112 = vmatpush.bf16.msra.mxu3 %v1049_v4 }
  0x73   : > { %486 = vmatpush.bf16.msra.mxu0 %v1048_v5  ;;  %1113 = vmatpush.bf16.msra.mxu1 %v1048_v5 }
  0x74   : > { %1114 = vmatpush.bf16.msra.mxu2 %v1048_v5  ;;  %1115 = vmatpush.bf16.msra.mxu3 %v1048_v5 }
  0x77   : > { %487 = vmatpush.bf16.msra.mxu0 %v1047_v6  ;;  %1116 = vmatpush.bf16.msra.mxu1 %v1047_v6 }
  0x78   : > { %1117 = vmatpush.bf16.msra.mxu2 %v1047_v6  ;;  %1118 = vmatpush.bf16.msra.mxu3 %v1047_v6 }
  0x7b   : > { %488 = vmatpush.bf16.msra.mxu0 %v1046_v7  ;;  %1119 = vmatpush.bf16.msra.mxu1 %v1046_v7 }
  0x7c   : > { %1120 = vmatpush.bf16.msra.mxu2 %v1046_v7  ;;  %1121 = vmatpush.bf16.msra.mxu3 %v1046_v7 }
  0x7f   : > { %489 = vmatpush.bf16.msra.mxu0 %v1045_v8  ;;  %1122 = vmatpush.bf16.msra.mxu1 %v1045_v8 }
  0x80   : > { %1123 = vmatpush.bf16.msra.mxu2 %v1045_v8  ;;  %1124 = vmatpush.bf16.msra.mxu3 %v1045_v8 }
  0x82   : > { %490 = vmatmul.bf16.vlgmr.msra.gmra.mxu0 %v1053_v9  ;;  %500 = vmatmul.bf16.vlgmr.msra.gmra.mxu1 %v1055_v10 }
  0x83   : > { %510 = vmatmul.bf16.vlgmr.msra.gmra.mxu2 %v1057_v11  ;;  %520 = vmatmul.bf16.vlgmr.msra.gmra.mxu3 %v1059_v12 }
  0x92   : > { %495 = vmatmul.bf16.gmra.mxu0 %v1054_v13  ;;  %505 = vmatmul.bf16.gmra.mxu1 %v1056_v14 }
  0x93   : > { %515 = vmatmul.bf16.gmra.mxu2 %v1058_v15  ;;  %525 = vmatmul.bf16.gmra.mxu3 %v1060_v16 }
  0xff   : > { %v491_v19 = vpop.f32.mrf.mxu0  ;;  %v501_v20 = vpop.f32.mrf.mxu1 }
 0x100   : > { %v531_v21 = vadd.f32 %v491_v19, %v354_v17  ;;  %v535_v22 = vadd.f32 %v501_v20, %v358_v18 }
 0x102   : > { %547 = vst [vmem:[#allocation2 + $0x30] sm:$0xff] %v531_v21 }
 0x103   : > { %551 = vst [vmem:[#allocation2 + $0x50] sm:$0xff] %v535_v22 }
 0x106   : > { %v511_v27 = vpop.f32.mrf.mxu2  ;;  %v521_v28 = vpop.f32.mrf.mxu3 }
 0x107   : > { %v539_v29 = vadd.f32 %v511_v27, %v362_v23  ;;  %v543_v30 = vadd.f32 %v521_v28, %v366_v24  ;;  %v493_v31 = vpop.f32.mrf.mxu0  ;;  %v503_v32 = vpop.f32.mrf.mxu1 }
 0x108   : > { %v532_v33 = vadd.f32 %v493_v31, %v355_v25  ;;  %v536_v34 = vadd.f32 %v503_v32, %v359_v26 }
 0x109   : > { %555 = vst [vmem:[#allocation2 + $0x40] sm:$0xff] %v539_v29 }
 0x10a   : > { %559 = vst [vmem:[#allocation2 + $0x60] sm:$0xff] %v543_v30 }
 0x10b   : > { %548 = vst [vmem:[#allocation2] sm:$0xff] %v532_v33 }
 0x10c   : > { %552 = vst [vmem:[#allocation2 + $0x68] sm:$0xff] %v536_v34 }
 0x10e   : > { %v513_v39 = vpop.f32.mrf.mxu2  ;;  %v523_v40 = vpop.f32.mrf.mxu3 }
 0x10f   : > { %v540_v41 = vadd.f32 %v513_v39, %v363_v35  ;;  %v544_v42 = vadd.f32 %v523_v40, %v367_v36  ;;  %v496_v43 = vpop.f32.mrf.mxu0  ;;  %v506_v44 = vpop.f32.mrf.mxu1 }
 0x110   : > { %v533_v45 = vadd.f32 %v496_v43, %v356_v37  ;;  %v537_v46 = vadd.f32 %v506_v44, %v360_v38 }
 0x111   : > { %556 = vst [vmem:[#allocation2 + $0x20] sm:$0xff] %v540_v41 }
 0x112   : > { %560 = vst [vmem:[#allocation2 + $0x70] sm:$0xff] %v544_v42 }
 0x113   : > { %549 = vst [vmem:[#allocation2 + $0x58] sm:$0xff] %v533_v45 }
 0x114   : > { %553 = vst [vmem:[#allocation2 + $0x8] sm:$0xff] %v537_v46 }
 0x116   : > { %v516_v51 = vpop.f32.mrf.mxu2  ;;  %v526_v52 = vpop.f32.mrf.mxu3 }
 0x117   : > { %v541_v53 = vadd.f32 %v516_v51, %v364_v47  ;;  %v545_v54 = vadd.f32 %v526_v52, %v368_v48  ;;  %v498_v55 = vpop.f32.mrf.mxu0  ;;  %v508_v56 = vpop.f32.mrf.mxu1 }
 0x118   : > { %v534_v57 = vadd.f32 %v498_v55, %v357_v49  ;;  %v538_v58 = vadd.f32 %v508_v56, %v361_v50 }
 0x119   : > { %557 = vst [vmem:[#allocation2 + $0x10] sm:$0xff] %v541_v53 }
 0x11a   : > { %561 = vst [vmem:[#allocation2 + $0x78] sm:$0xff] %v545_v54 }
 0x11b   : > { %550 = vst [vmem:[#allocation2 + $0x18] sm:$0xff] %v534_v57 }
 0x11c   : > { %554 = vst [vmem:[#allocation2 + $0x48] sm:$0xff] %v538_v58 }
 0x11e   : > { %v518_v61 = vpop.f32.mrf.mxu2  ;;  %v528_v62 = vpop.f32.mrf.mxu3  ;;  %566 = sbr.rel (%p1037_p1) target bundleno = 516 (0x204), region = 64 }
 0x11f   : > { %v542_v63 = vadd.f32 %v518_v61, %v365_v59  ;;  %v546_v0 = vadd.f32 %v528_v62, %v369_v60 }
 0x121   : > { %558 = vst [vmem:[#allocation2 + $0x38] sm:$0xff] %v542_v63 }
 0x122   : > { %562 = vst [vmem:[#allocation2 + $0x28] sm:$0xff] %v546_v0 }
 0x123   : > { %v635_v1 = vld [vmem:[#allocation8 + $0x78] sm:$0xff]  ;;  %v634_v2 = vld [vmem:[#allocation8 + $0x70] sm:$0xff]  ;;  %v633_v5 = vld [vmem:[#allocation8 + $0x68] sm:$0xff] }
 0x124   : > { %v720_v3 = vld [vmem:[#allocation9 + $0x78] sm:$0xff]  ;;  %1125 = vmatpush.msra.mxu2 %v635_v1  ;;  %v719_v4 = vld [vmem:[#allocation9 + $0x70] sm:$0xff]  ;;  %640 = vmatpush.msra.mxu0 %v635_v1  ;;  %v718_v6 = vld [vmem:[#allocation9 + $0x68] sm:$0xff] }
 0x125   : > { %1141 = vmatpush.msra.mxu3 %v720_v3  ;;  %721 = vmatpush.msra.mxu1 %v720_v3  ;;  %v632_v7 = vld [vmem:[#allocation8 + $0x60] sm:$0xff]  ;;  %v631_v9 = vld [vmem:[#allocation8 + $0x58] sm:$0xff]  ;;  %v630_v11 = vld [vmem:[#allocation8 + $0x50] sm:$0xff] }
 0x126   : > { %1126 = vmatpush.msra.mxu2 %v634_v2  ;;  %641 = vmatpush.msra.mxu0 %v634_v2  ;;  %v717_v8 = vld [vmem:[#allocation9 + $0x60] sm:$0xff]  ;;  %v716_v10 = vld [vmem:[#allocation9 + $0x58] sm:$0xff]  ;;  %v715_v12 = vld [vmem:[#allocation9 + $0x50] sm:$0xff] }
 0x127   : > { %1142 = vmatpush.msra.mxu3 %v719_v4  ;;  %722 = vmatpush.msra.mxu1 %v719_v4  ;;  %v629_v13 = vld [vmem:[#allocation8 + $0x48] sm:$0xff]  ;;  %v628_v15 = vld [vmem:[#allocation8 + $0x40] sm:$0xff]  ;;  %v627_v17 = vld [vmem:[#allocation8 + $0x38] sm:$0xff] }
 0x128   : > { %1127 = vmatpush.msra.mxu2 %v633_v5  ;;  %642 = vmatpush.msra.mxu0 %v633_v5  ;;  %v714_v14 = vld [vmem:[#allocation9 + $0x48] sm:$0xff]  ;;  %v713_v16 = vld [vmem:[#allocation9 + $0x40] sm:$0xff]  ;;  %v712_v18 = vld [vmem:[#allocation9 + $0x38] sm:$0xff] }
 0x129   : > { %1143 = vmatpush.msra.mxu3 %v718_v6  ;;  %723 = vmatpush.msra.mxu1 %v718_v6  ;;  %v626_v19 = vld [vmem:[#allocation8 + $0x30] sm:$0xff]  ;;  %v625_v21 = vld [vmem:[#allocation8 + $0x28] sm:$0xff]  ;;  %v624_v23 = vld [vmem:[#allocation8 + $0x20] sm:$0xff] }
 0x12a   : > { %1128 = vmatpush.msra.mxu2 %v632_v7  ;;  %643 = vmatpush.msra.mxu0 %v632_v7  ;;  %v711_v20 = vld [vmem:[#allocation9 + $0x30] sm:$0xff]  ;;  %v710_v22 = vld [vmem:[#allocation9 + $0x28] sm:$0xff]  ;;  %v709_v24 = vld [vmem:[#allocation9 + $0x20] sm:$0xff] }
 0x12b   : > { %1144 = vmatpush.msra.mxu3 %v717_v8  ;;  %724 = vmatpush.msra.mxu1 %v717_v8  ;;  %v623_v25 = vld [vmem:[#allocation8 + $0x18] sm:$0xff]  ;;  %v622_v27 = vld [vmem:[#allocation8 + $0x10] sm:$0xff]  ;;  %v1097_v29 = vld [vmem:[%s1786_s9 + $0x20] sm:$0xff]  }
 0x12c   : > { %1129 = vmatpush.msra.mxu2 %v631_v9  ;;  %644 = vmatpush.msra.mxu0 %v631_v9  ;;  %v708_v26 = vld [vmem:[#allocation9 + $0x18] sm:$0xff]  ;;  %v707_v28 = vld [vmem:[#allocation9 + $0x10] sm:$0xff]  ;;  %v621_v30 = vld [vmem:[#allocation8 + $0x8] sm:$0xff]  ;;  %v1080_v35 = vunpack.c.l.bf16 %v1097_v29  ;;  %v1081_v39 = vunpack.c.h.bf16 %v1097_v29 }
 0x12d   : > { %1145 = vmatpush.msra.mxu3 %v716_v10  ;;  %725 = vmatpush.msra.mxu1 %v716_v10  ;;  %v706_v31 = vld [vmem:[#allocation9 + $0x8] sm:$0xff]  ;;  %v1063_v32 = vld [vmem:[%s1786_s9] sm:$0xff]   ;;  %v604_v38 = vld [vmem:[#allocation2 + $0x30] sm:$0xff] }
 0x12e   : > { %1130 = vmatpush.msra.mxu2 %v630_v11  ;;  %645 = vmatpush.msra.mxu0 %v630_v11  ;;  %v620_v33 = vld [vmem:[#allocation8] sm:$0xff]  ;;  %v1064_v37 = vunpack.c.l.bf16 %v1063_v32  ;;  %v1065_v41 = vunpack.c.h.bf16 %v1063_v32  ;;  %v1098_v43 = vld [vmem:[%s1786_s9 + $0x28] sm:$0xff]   ;;  %v614_v46 = vld [vmem:[#allocation2 + $0x10] sm:$0xff] }
 0x12f   : > { %1146 = vmatpush.msra.mxu3 %v715_v12  ;;  %726 = vmatpush.msra.mxu1 %v715_v12  ;;  %v705_v34 = vld [vmem:[#allocation9] sm:$0xff]  ;;  %v1094_v44 = vld [vmem:[%s1786_s9 + $0x8] sm:$0xff]   ;;  %v1084_v45 = vunpack.c.l.bf16 %v1098_v43  ;;  %v606_v48 = vld [vmem:[#allocation2 + $0x58] sm:$0xff]  ;;  %v1085_v49 = vunpack.c.h.bf16 %v1098_v43 }
 0x130   : > { %1131 = vmatpush.msra.mxu2 %v629_v13  ;;  %646 = vmatpush.msra.mxu0 %v629_v13  ;;  %v612_v36 = vld [vmem:[#allocation2 + $0x40] sm:$0xff]  ;;  %v1068_v47 = vunpack.c.l.bf16 %v1094_v44  ;;  %v615_v50 = vld [vmem:[#allocation2 + $0x38] sm:$0xff]  ;;  %v1069_v51 = vunpack.c.h.bf16 %v1094_v44  ;;  %v1099_v53 = vld [vmem:[%s1786_s9 + $0x30] sm:$0xff]  }
 0x131   : > { %1147 = vmatpush.msra.mxu3 %v714_v14  ;;  %727 = vmatpush.msra.mxu1 %v714_v14  ;;  %v613_v40 = vld [vmem:[#allocation2 + $0x20] sm:$0xff]  ;;  %v607_v52 = vld [vmem:[#allocation2 + $0x18] sm:$0xff]  ;;  %v1095_v54 = vld [vmem:[%s1786_s9 + $0x10] sm:$0xff]   ;;  %v1088_v55 = vunpack.c.l.bf16 %v1099_v53  ;;  %v1089_v59 = vunpack.c.h.bf16 %v1099_v53 }
 0x132   : > { %1132 = vmatpush.msra.mxu2 %v628_v15  ;;  %647 = vmatpush.msra.mxu0 %v628_v15  ;;  %v605_v42 = vld [vmem:[#allocation2] sm:$0xff]  ;;  %v1072_v57 = vunpack.c.l.bf16 %v1095_v54  ;;  %v608_v58 = vld [vmem:[#allocation2 + $0x50] sm:$0xff]  ;;  %v1073_v61 = vunpack.c.h.bf16 %v1095_v54  ;;  %v609_v62 = vld [vmem:[#allocation2 + $0x68] sm:$0xff] }
 0x133   : > { %1148 = vmatpush.msra.mxu3 %v713_v16  ;;  %728 = vmatpush.msra.mxu1 %v713_v16  ;;  %v616_v56 = vld [vmem:[#allocation2 + $0x60] sm:$0xff]  ;;  %v617_v60 = vld [vmem:[#allocation2 + $0x70] sm:$0xff]  ;;  %v1100_v63 = vld [vmem:[%s1786_s9 + $0x38] sm:$0xff]  }
 0x134   : > { %1133 = vmatpush.msra.mxu2 %v627_v17  ;;  %648 = vmatpush.msra.mxu0 %v627_v17  ;;  %v1096_v0 = vld [vmem:[%s1786_s9 + $0x18] sm:$0xff]   ;;  %v1092_v1 = vunpack.c.l.bf16 %v1100_v63  ;;  %v610_v4 = vld [vmem:[#allocation2 + $0x8] sm:$0xff]  ;;  %v1093_v5 = vunpack.c.h.bf16 %v1100_v63  ;;  %v1799_v9 = vld [vmem:[%s1926_s16] ss:$0 sm:$0xff] }
 0x135   : > { %1149 = vmatpush.msra.mxu3 %v712_v18  ;;  %729 = vmatpush.msra.mxu1 %v712_v18  ;;  %v618_v2 = vld [vmem:[#allocation2 + $0x78] sm:$0xff]  ;;  %v1076_v3 = vunpack.c.l.bf16 %v1096_v0  ;;  %v619_v6 = vld [vmem:[#allocation2 + $0x28] sm:$0xff]  ;;  %v1077_v7 = vunpack.c.h.bf16 %v1096_v0 }
 0x136   : > { %1134 = vmatpush.msra.mxu2 %v626_v19  ;;  %649 = vmatpush.msra.mxu0 %v626_v19  ;;  %v611_v8 = vld [vmem:[#allocation2 + $0x48] sm:$0xff] }
 0x137   : > { %1150 = vmatpush.msra.mxu3 %v711_v20  ;;  %730 = vmatpush.msra.mxu1 %v711_v20 }
 0x138   : > { %1135 = vmatpush.msra.mxu2 %v625_v21  ;;  %650 = vmatpush.msra.mxu0 %v625_v21 }
 0x139   : > { %1151 = vmatpush.msra.mxu3 %v710_v22  ;;  %731 = vmatpush.msra.mxu1 %v710_v22 }
 0x13a   : > { %1136 = vmatpush.msra.mxu2 %v624_v23  ;;  %651 = vmatpush.msra.mxu0 %v624_v23 }
 0x13b   : > { %1152 = vmatpush.msra.mxu3 %v709_v24  ;;  %732 = vmatpush.msra.mxu1 %v709_v24 }
 0x13c   : > { %1137 = vmatpush.msra.mxu2 %v623_v25  ;;  %652 = vmatpush.msra.mxu0 %v623_v25 }
 0x13d   : > { %1153 = vmatpush.msra.mxu3 %v708_v26  ;;  %733 = vmatpush.msra.mxu1 %v708_v26 }
 0x13e   : > { %1138 = vmatpush.msra.mxu2 %v622_v27  ;;  %653 = vmatpush.msra.mxu0 %v622_v27 }
 0x13f   : > { %1154 = vmatpush.msra.mxu3 %v707_v28  ;;  %734 = vmatpush.msra.mxu1 %v707_v28 }
 0x140   : > { %1139 = vmatpush.msra.mxu2 %v621_v30  ;;  %654 = vmatpush.msra.mxu0 %v621_v30 }
 0x141   : > { %1155 = vmatpush.msra.mxu3 %v706_v31  ;;  %735 = vmatpush.msra.mxu1 %v706_v31 }
 0x142   : > { %1140 = vmatpush.msra.mxu2 %v620_v33  ;;  %655 = vmatpush.msra.mxu0 %v620_v33 }
 0x143   : > { %1156 = vmatpush.msra.mxu3 %v705_v34  ;;  %680 = vmatmul.f32.vlgmr.msra.gmra.mxu2 %v612_v36 }
 0x144   : > { %761 = vmatmul.f32.vlgmr.msra.gmra.mxu3 %v1080_v35  ;;  %736 = vmatpush.msra.mxu1 %v705_v34 }
 0x145   : > { %656 = vmatmul.f32.vlgmr.msra.gmra.mxu0 %v604_v38  ;;  %737 = vmatmul.f32.vlgmr.msra.gmra.mxu1 %v1064_v37 }
 0x14b   : > { %683 = vmatmul.f32.gmra.mxu2 %v613_v40 }
 0x14c   : > { %764 = vmatmul.f32.gmra.mxu3 %v1081_v39 }
 0x14d   : > { %659 = vmatmul.f32.gmra.mxu0 %v605_v42  ;;  %740 = vmatmul.f32.gmra.mxu1 %v1065_v41 }
 0x153   : > { %686 = vmatmul.f32.gmra.mxu2 %v614_v46 }
 0x154   : > { %767 = vmatmul.f32.gmra.mxu3 %v1084_v45 }
 0x155   : > { %662 = vmatmul.f32.gmra.mxu0 %v606_v48  ;;  %743 = vmatmul.f32.gmra.mxu1 %v1068_v47 }
 0x15b   : > { %689 = vmatmul.f32.gmra.mxu2 %v615_v50 }
 0x15c   : > { %770 = vmatmul.f32.gmra.mxu3 %v1085_v49 }
 0x15d   : > { %665 = vmatmul.f32.gmra.mxu0 %v607_v52  ;;  %746 = vmatmul.f32.gmra.mxu1 %v1069_v51 }
 0x163   : > { %692 = vmatmul.f32.gmra.mxu2 %v616_v56 }
 0x164   : > { %773 = vmatmul.f32.gmra.mxu3 %v1088_v55 }
 0x165   : > { %668 = vmatmul.f32.gmra.mxu0 %v608_v58  ;;  %749 = vmatmul.f32.gmra.mxu1 %v1072_v57 }
 0x16b   : > { %695 = vmatmul.f32.gmra.mxu2 %v617_v60 }
 0x16c   : > { %776 = vmatmul.f32.gmra.mxu3 %v1089_v59 }
 0x16d   : > { %671 = vmatmul.f32.gmra.mxu0 %v609_v62  ;;  %752 = vmatmul.f32.gmra.mxu1 %v1073_v61 }
 0x173   : > { %698 = vmatmul.f32.gmra.mxu2 %v618_v2 }
 0x174   : > { %779 = vmatmul.f32.gmra.mxu3 %v1092_v1 }
 0x175   : > { %674 = vmatmul.f32.gmra.mxu0 %v610_v4  ;;  %755 = vmatmul.f32.gmra.mxu1 %v1076_v3 }
 0x17b   : > { %701 = vmatmul.f32.gmra.mxu2 %v619_v6 }
 0x17c   : > { %782 = vmatmul.f32.gmra.mxu3 %v1093_v5 }
 0x17d   : > { %677 = vmatmul.f32.gmra.mxu0 %v611_v8  ;;  %758 = vmatmul.f32.gmra.mxu1 %v1077_v7 }
 0x1c2   : > { %v657_v10 = vpop.f32.mrf.mxu0  ;;  %v738_v11 = vpop.f32.mrf.mxu1 }
 0x1c3   : > { %v658_v12 = vadd.f32 %v1799_v9, %v657_v10 }
 0x1c5   : > { %v786_v13 = vadd.f32 %v738_v11, %v658_v12 }
 0x1c6   : > { %v681_v14 = vpop.f32.mrf.mxu2 }
 0x1c7   : > { %v762_v15 = vpop.f32.mrf.mxu3  ;;  %v682_v16 = vadd.f32 %v1799_v9, %v681_v14  ;;  %802 = vst [vmem:[%s1762_s25] sm:$0xff] %v786_v13 }
 0x1c9   : > { %v794_v17 = vadd.f32 %v762_v15, %v682_v16 }
 0x1ca   : > { %v660_v18 = vpop.f32.mrf.mxu0  ;;  %v741_v19 = vpop.f32.mrf.mxu1 }
 0x1cb   : > { %810 = vst [vmem:[%s1762_s25 + $0x40] sm:$0xff] %v794_v17  ;;  %v661_v20 = vadd.f32 %v1799_v9, %v660_v18 }
 0x1cd   : > { %v787_v21 = vadd.f32 %v741_v19, %v661_v20 }
 0x1ce   : > { %v684_v22 = vpop.f32.mrf.mxu2 }
 0x1cf   : > { %v765_v23 = vpop.f32.mrf.mxu3  ;;  %v685_v24 = vadd.f32 %v1799_v9, %v684_v22  ;;  %803 = vst [vmem:[%s1762_s25 + $0x8] sm:$0xff] %v787_v21 }
 0x1d1   : > { %v795_v25 = vadd.f32 %v765_v23, %v685_v24 }
 0x1d2   : > { %v663_v26 = vpop.f32.mrf.mxu0  ;;  %v744_v27 = vpop.f32.mrf.mxu1 }
 0x1d3   : > { %811 = vst [vmem:[%s1762_s25 + $0x48] sm:$0xff] %v795_v25  ;;  %v664_v28 = vadd.f32 %v1799_v9, %v663_v26 }
 0x1d5   : > { %v788_v29 = vadd.f32 %v744_v27, %v664_v28 }
 0x1d6   : > { %v687_v30 = vpop.f32.mrf.mxu2 }
 0x1d7   : > { %v768_v31 = vpop.f32.mrf.mxu3  ;;  %v688_v32 = vadd.f32 %v1799_v9, %v687_v30  ;;  %804 = vst [vmem:[%s1762_s25 + $0x10] sm:$0xff] %v788_v29 }
 0x1d9   : > { %v796_v33 = vadd.f32 %v768_v31, %v688_v32 }
 0x1da   : > { %v666_v34 = vpop.f32.mrf.mxu0  ;;  %v747_v35 = vpop.f32.mrf.mxu1 }
 0x1db   : > { %812 = vst [vmem:[%s1762_s25 + $0x50] sm:$0xff] %v796_v33  ;;  %v667_v36 = vadd.f32 %v1799_v9, %v666_v34 }
 0x1dd   : > { %v789_v37 = vadd.f32 %v747_v35, %v667_v36 }
 0x1de   : > { %v690_v38 = vpop.f32.mrf.mxu2 }
 0x1df   : > { %v771_v39 = vpop.f32.mrf.mxu3  ;;  %v691_v40 = vadd.f32 %v1799_v9, %v690_v38  ;;  %805 = vst [vmem:[%s1762_s25 + $0x18] sm:$0xff] %v789_v37 }
 0x1e1   : > { %v797_v41 = vadd.f32 %v771_v39, %v691_v40 }
 0x1e2   : > { %v669_v42 = vpop.f32.mrf.mxu0  ;;  %v750_v43 = vpop.f32.mrf.mxu1 }
 0x1e3   : > { %813 = vst [vmem:[%s1762_s25 + $0x58] sm:$0xff] %v797_v41  ;;  %v670_v44 = vadd.f32 %v1799_v9, %v669_v42 }
 0x1e5   : > { %v790_v45 = vadd.f32 %v750_v43, %v670_v44 }
 0x1e6   : > { %v693_v46 = vpop.f32.mrf.mxu2 }
 0x1e7   : > { %v774_v47 = vpop.f32.mrf.mxu3  ;;  %v694_v48 = vadd.f32 %v1799_v9, %v693_v46  ;;  %806 = vst [vmem:[%s1762_s25 + $0x20] sm:$0xff] %v790_v45 }
 0x1e9   : > { %v798_v49 = vadd.f32 %v774_v47, %v694_v48 }
 0x1ea   : > { %v672_v50 = vpop.f32.mrf.mxu0  ;;  %v753_v51 = vpop.f32.mrf.mxu1 }
 0x1eb   : > { %814 = vst [vmem:[%s1762_s25 + $0x60] sm:$0xff] %v798_v49  ;;  %v673_v52 = vadd.f32 %v1799_v9, %v672_v50 }
 0x1ed   : > { %v791_v53 = vadd.f32 %v753_v51, %v673_v52 }
 0x1ee   : > { %v696_v54 = vpop.f32.mrf.mxu2 }
 0x1ef   : > { %v777_v55 = vpop.f32.mrf.mxu3  ;;  %v697_v56 = vadd.f32 %v1799_v9, %v696_v54  ;;  %807 = vst [vmem:[%s1762_s25 + $0x28] sm:$0xff] %v791_v53 }
 0x1f1   : > { %v799_v57 = vadd.f32 %v777_v55, %v697_v56 }
 0x1f2   : > { %v675_v58 = vpop.f32.mrf.mxu0  ;;  %v756_v59 = vpop.f32.mrf.mxu1 }
 0x1f3   : > { %815 = vst [vmem:[%s1762_s25 + $0x68] sm:$0xff] %v799_v57  ;;  %v676_v60 = vadd.f32 %v1799_v9, %v675_v58 }
 0x1f5   : > { %v792_v61 = vadd.f32 %v756_v59, %v676_v60 }
 0x1f6   : > { %v699_v62 = vpop.f32.mrf.mxu2 }
 0x1f7   : > { %v780_v63 = vpop.f32.mrf.mxu3  ;;  %v700_v0 = vadd.f32 %v1799_v9, %v699_v62  ;;  %808 = vst [vmem:[%s1762_s25 + $0x30] sm:$0xff] %v792_v61 }
 0x1f9   : > { %v800_v1 = vadd.f32 %v780_v63, %v700_v0 }
 0x1fa   : > { %v678_v2 = vpop.f32.mrf.mxu0  ;;  %v759_v3 = vpop.f32.mrf.mxu1 }
 0x1fb   : > { %816 = vst [vmem:[%s1762_s25 + $0x70] sm:$0xff] %v800_v1  ;;  %v679_v4 = vadd.f32 %v1799_v9, %v678_v2 }
 0x1fd   : > { %v793_v5 = vadd.f32 %v759_v3, %v679_v4 }
 0x1fe   : > { %v702_v6 = vpop.f32.mrf.mxu2 }
 0x1ff   : > { %v783_v7 = vpop.f32.mrf.mxu3  ;;  %v703_v8 = vadd.f32 %v1799_v9, %v702_v6  ;;  %809 = vst [vmem:[%s1762_s25 + $0x38] sm:$0xff] %v793_v5 }
 0x201   : > { %v801_v10 = vadd.f32 %v783_v7, %v703_v8 }
 0x203   : > { %817 = vst [vmem:[%s1762_s25 + $0x78] sm:$0xff] %v801_v10 }
 0x204 PF: > { %s1927_s21 = sld [smem:[#allocation17_spill]]  ;;  %s831_s6 = sshll.u32 %s1762_s25, 4  ;;  %s832_s6 = int_to_ptr.vmem [resolvable:$true] %s831_s6 }
 0x205   : > { %s1929_s3 = sld [smem:[#allocation26_spill]]  ;;  %s819_s8 = scalar_lea.sflag [#allocation5], %s308_s5 }
 0x20a   : > { %s1061_s4 = sshll.u32 %s1927_s21, 7 }
 0x20b   : > { %s830_s18 = scalar_lea.hbm %s1929_s3, %s1061_s4  ;;  %s1440_s2 = scalar_lea.hbm %s1929_s3, 384 }
 0x20c   : > { %s833_s7 = sshll.u32 %s830_s18, 4  ;;  %s834_s7 = int_to_ptr.hbm [resolvable:$true] %s833_s7 }
 0x20d   : > { %s1434_s10 = sshra.s32 %s834_s7, 4  ;;  %s1435_s10 = int_to_ptr.hbm [resolvable:$true] %s1434_s10 }
 0x20e   : > { %s1436_s24 = scalar_lea.hbm %s1435_s10, 128  ;;  %p1441_p3 = scmp.lt.s32.totalorder %s1435_s10, %s1929_s3 }
 0x20f   : > { %p1437_p11 = scmp.ne.s32.totalorder %s1435_s10, %s1436_s24  ;;  %p1442_p5 = scmp.lt.s32.totalorder %s1440_s2, %s1436_s24 }
 0x211   : > { %p1438_p0 = pnand %p1437_p11, %p1663_p6  ;;  %p1443_p7 = por %p1442_p5, %p1441_p3 }
 0x213   : > { %p1439_p2 = pneg %p1438_p0 }
 0x215   : > { %p1444_p8 = pnand %p1443_p7, %p1439_p2 }
 0x217   : > { %1447 = shalt.err (!%p1444_p8)
}
 0x218   : > { %s1561_s5 = smov 128   ;;  %s1562_s25 = smov 8  }
 0x219   : > { %1172 = dma.vmem_to_hbm [thread:$0]  (%p1663_p6), %s832_s6, 2048, %s834_s7, %s819_s8, %s1561_s5, %s1561_s5, %s1562_s25  }
 0x21a PF: > { %s1930_s29 = sld [smem:[#allocation16_spill]]  ;;  %p1199_p9 = scmp.ge.s32.totalorder %s1550_s28, 2 }
 0x21c   : > { %p1189_p12 = pnand %p1199_p9, %p1669_p10 }
 0x21e   : > { %p1190_p13 = pneg %p1189_p12 }
 0x220   : > { %s848_s21 = sand.u32 1, %s1930_s29  }
 0x221   : > { %s849_s4 = scalar_lea.sflag [#allocation5], %s848_s21 }
 0x222   : > { %1505 = dma.done.wait (%p1190_p13), %s849_s4, 2048  }
 0x223   : > { %1507 = vsyncadd (%p1190_p13), %s849_s4, 4294965248  ;;  %s23_s28 = sadd.s32 1, %s1550_s28   ;;  %s1932_s1 = sld [smem:[#allocation20_spill]] }
 0x224   : > { %p20_p4 = scmp.ge.s32.totalorder %s23_s28, 11   ;;  %s1933_s12 = sld [smem:[#allocation21_spill]] }
 0x225   : > { %s1934_s18 = smov %s1514_s19  ;;  %s1935_s19 = smov %s1518_s20 }
 0x226   : > { %s1936_s20 = smov %s1727_s15  ;;  %s1937_s21 = smov %s1526_s22 }
 0x227   : > { %s1938_s22 = smov %s1530_s23  ;;  %s1939_s23 = smov %s1730_s11 }
 0x228   : > { %s1940_s24 = smov %s1542_s26  ;;  %s1941_s25 = smov %s1546_s27 }
 0x229   : > { %s1942_s26 = smov %s1932_s1  ;;  %22 = sbr.rel (!%p20_p4) target bundleno = 17 (0x11), region = 107 }
 0x22a   : > { %s1943_s27 = smov %s1933_s12 }
 0x22e   :  { %855 = vsyncpa [#allocation4], 1 }
 0x22f   :  { %857 = vsyncpa [#allocation4 + $0x1], 1 }
 0x230   :  { %858 = vsyncpa [#allocation7], 1 }
 0x231   :  { %859 = vsyncpa [#allocation10], 1 }
 0x232   :  { %860 = vsyncpa [#allocation5], 1 }
 0x233   :  { %862 = vsyncpa [#allocation5 + $0x1], 1 }

</bundles_post_ra>
